<compile_context>
chip_gen: v6e
topology: v6e:2x2x1
jax: 0.10.0
libtpu: 0.0.40
codegen_flags: <defaults>
</compile_context>

<pallas_src>
import functools
import math

import jax
import jax.numpy as jnp
from jax.experimental import pallas as pl
from jax.experimental.pallas import tpu as pltpu


def _round_up(a: int, b: int) -> int:
    return -(-a // b) * b


def _std_kernel(x_ref, o_ref, *, inv_n, inv_nm1):
    """Unbiased std of each row of the (tr, T) block, written as a (tr, 1) column."""
    x = x_ref[...].astype(jnp.float32)
    s1 = jnp.sum(x, axis=-1, keepdims=True)        # (tr, 1)  sum x
    s2 = jnp.sum(x * x, axis=-1, keepdims=True)    # (tr, 1)  sum x^2
    var = (s2 - (s1 * s1) * inv_n) * inv_nm1       # single-pass unbiased variance
    var = jnp.maximum(var, 0.0)                    # guard tiny negatives (cancellation)
    o_ref[...] = jnp.sqrt(var).astype(o_ref.dtype)


_DEFAULT_BLOCK_BYTES = 10 * 1024 * 1024   # VMEM budget per pipeline buffer (in + out)
_VMEM_LIMIT_BYTES = 32 * 1024 * 1024      # safe on v5e / v6e / v7x


def std_layer(x, dim=3, *, block_bytes=_DEFAULT_BLOCK_BYTES):
    """Pallas TPU implementation of torch.Tensor.std(dim, keepdim=True) (unbiased)."""
    ndim = x.ndim
    dim = dim if dim >= 0 else dim + ndim

    # Move the reduction axis last and flatten the rest.  For dim == last axis
    # (the FBCNet case) this is a no-op view.
    # TODO(synk): for non-minor dims this materializes a full HBM transpose;
    # expressing the reduction through the grid/BlockSpec would avoid that.
    x_moved = jnp.moveaxis(x, dim, -1)
    lead_shape = x_moved.shape[:-1]
    n = x_moved.shape[-1]
    rows = math.prod(lead_shape) if lead_shape else 1
    x2d = x_moved.reshape(rows, n)

    # ---- row-tile sizing ----------------------------------------------------
    # VMEM footprint per block row: the input row pads its lane dim to 128 and
    # the (tr, 1) output block also pads to 128 lanes.
    itemsize = jnp.dtype(x.dtype).itemsize
    in_row_bytes = itemsize * _round_up(max(n, 1), 128)
    out_row_bytes = itemsize * 128
    tr = block_bytes // (in_row_bytes + out_row_bytes)
    tr = max(128, (tr // 128) * 128)          # multiple of 128 (>= (8,128) rule)
    tr = min(tr, _round_up(rows, 128))        # never (much) larger than the problem
    # Balance tiles so tail padding is < 128 rows per tile.
    num_tiles = -(-rows // tr)
    tr = _round_up(-(-rows // num_tiles), 128)
    rows_padded = num_tiles * tr
    # TODO(synk): if n is so large that a single (128, n) block exceeds the VMEM
    # budget, the time axis would need its own (accumulating) grid axis.

    if rows_padded != rows:
        # Zero-pad extra rows; their std (=0) is sliced off below.
        x2d = jnp.pad(x2d, ((0, rows_padded - rows), (0, 0)))

    ddof = 1.0  # torch.std default: unbiased estimator
    inv_n = 1.0 / float(n)
    inv_nm1 = 1.0 / (n - ddof) if n > ddof else float("nan")  # n==1 -> nan (matches torch)
    kernel = functools.partial(_std_kernel, inv_n=inv_n, inv_nm1=inv_nm1)

    out2d = pl.pallas_call(
        kernel,
        out_shape=jax.ShapeDtypeStruct((rows_padded, 1), x.dtype),
        grid_spec=pltpu.PrefetchScalarGridSpec(
            num_scalar_prefetch=0,
            grid=(num_tiles,),
            in_specs=[pl.BlockSpec((tr, n), lambda i: (i, 0))],
            out_specs=pl.BlockSpec((tr, 1), lambda i: (i, 0)),
        ),
        compiler_params=pltpu.CompilerParams(
            dimension_semantics=("parallel",),   # row tiles shard across TCs on v7x
            vmem_limit_bytes=_VMEM_LIMIT_BYTES,
        ),
    )(x2d)

    out = out2d[:rows].reshape(lead_shape + (1,))
    return jnp.moveaxis(out, -1, dim)


if __name__ == "__main__":
    key = jax.random.PRNGKey(0)

    # FBCNet StdLayer: input (B, C, H, T), std over the temporal axis dim=3.
    B, C, H, T = 2, 4, 16, 16
    x = jax.random.normal(key, (B, C, H, T), dtype=jnp.float32)
    y = jax.block_until_ready(std_layer(x, dim=3))
    ref = jnp.std(x, axis=3, keepdims=True, ddof=1)
    assert y.shape == (B, C, H, 1), y.shape
    assert jnp.allclose(y, ref, atol=1e-5, rtol=1e-4), float(jnp.max(jnp.abs(y - ref)))

    # Awkward sizes: rows not a multiple of 8, T not a multiple of 128
    # (exercises the row-padding path and the masked lane reduction).
    x2 = jax.random.normal(jax.random.PRNGKey(1), (3, 5, 7, 50), dtype=jnp.float32)
    y2 = jax.block_until_ready(std_layer(x2, dim=3))
    ref2 = jnp.std(x2, axis=3, keepdims=True, ddof=1)
    assert y2.shape == (3, 5, 7, 1), y2.shape
    assert jnp.allclose(y2, ref2, atol=1e-5, rtol=1e-4), float(jnp.max(jnp.abs(y2 - ref2)))

    # Force a multi-tile grid with a tiny block budget to exercise the pipeline.
    x3 = jax.random.normal(jax.random.PRNGKey(2), (4, 8, 8, 128), dtype=jnp.float32)
    y3 = jax.block_until_ready(std_layer(x3, dim=3, block_bytes=64 * 1024))
    ref3 = jnp.std(x3, axis=3, keepdims=True, ddof=1)
    assert jnp.allclose(y3, ref3, atol=1e-5, rtol=1e-4), float(jnp.max(jnp.abs(y3 - ref3)))

    print("KERNEL_OK")
</pallas_src>

<mosaic_0001>
module attributes {stable_mosaic.version = 11 : i64} {
  func.func @_std_kernel(%arg0: i32, %arg1: memref<128x16xf32, #tpu.memory_space<vmem>>, %arg2: memref<128x1xf32, #tpu.memory_space<vmem>>) attributes {dimension_semantics = [#tpu.dimension_semantics<parallel>], iteration_bounds = array<i64: 1>, scalar_prefetch = 0 : i64, scratch_operands = 0 : i64, tpu.core_type = #tpu.core_type<tc>, window_params = [{transform_indices = @transform_0, window_bounds = array<i64: 128, 16>}, {transform_indices = @transform_1, window_bounds = array<i64: 128, 1>}]} {
    %c0 = arith.constant 0 : index
    %c0_0 = arith.constant 0 : index
    %0 = vector.load %arg1[%c0, %c0_0] : memref<128x16xf32, #tpu.memory_space<vmem>>, vector<128x16xf32>
    %cst = arith.constant dense<0.000000e+00> : vector<128xf32>
    %1 = vector.multi_reduction <add>, %0, %cst [1] : vector<128x16xf32> to vector<128xf32>
    %2 = vector.shape_cast %1 : vector<128xf32> to vector<128x1xf32>
    %3 = arith.mulf %0, %0 : vector<128x16xf32>
    %cst_1 = arith.constant dense<0.000000e+00> : vector<128xf32>
    %4 = vector.multi_reduction <add>, %3, %cst_1 [1] : vector<128x16xf32> to vector<128xf32>
    %5 = vector.shape_cast %4 : vector<128xf32> to vector<128x1xf32>
    %6 = arith.mulf %2, %2 : vector<128x1xf32>
    %cst_2 = arith.constant 6.250000e-02 : f32
    %7 = vector.broadcast %cst_2 : f32 to vector<128x1xf32>
    %8 = arith.mulf %6, %7 : vector<128x1xf32>
    %9 = arith.subf %5, %8 : vector<128x1xf32>
    %cst_3 = arith.constant 0.0666666701 : f32
    %10 = vector.broadcast %cst_3 : f32 to vector<128x1xf32>
    %11 = arith.mulf %9, %10 : vector<128x1xf32>
    %cst_4 = arith.constant 0.000000e+00 : f32
    %12 = vector.broadcast %cst_4 : f32 to vector<128x1xf32>
    %13 = arith.maximumf %11, %12 : vector<128x1xf32>
    %14 = math.sqrt %13 : vector<128x1xf32>
    %c0_5 = arith.constant 0 : index
    %c0_6 = arith.constant 0 : index
    %15 = vector.load %arg2[%c0_5, %c0_6] : memref<128x1xf32, #tpu.memory_space<vmem>>, vector<128x1xf32>
    tpu.vector_store %arg2[%c0_5, %c0_6], %14 {strides = array<i32>} : memref<128x1xf32, #tpu.memory_space<vmem>>, vector<128x1xf32>,
    return
  }
  func.func @transform_0(%arg0: i32) -> (i32, i32) {
    %c0_i32 = arith.constant 0 : i32
    %c0_i32_0 = arith.constant 0 : i32
    return %arg0, %c0_i32 : i32, i32
  }
  func.func @transform_1(%arg0: i32) -> (i32, i32) {
    %c0_i32 = arith.constant 0 : i32
    %c0_i32_0 = arith.constant 0 : i32
    return %arg0, %c0_i32 : i32, i32
  }
}

</mosaic_0001>

<bundles_post_ra>
// kernel: tpu_custom_call.1
= control target key start
LH: loop header
LB: loop body
LE: loop exit
PB: predicated region body
PF: predicated region fallthrough
CT: control target
= control target key end

     0   :  { %vm24_vm0 = vcmask 130048   ;;  %vm329_vm1 = vcmask 7168   ;;  %s679_s0 = inlined_call_operand.vmem [shape: f32[128,16], index: 0, kind: input, shape index: {}]   ;;  %s680_s1 = inlined_call_operand.vmem [shape: f32[128,1], index: 1, kind: output, shape index: {}]  }
   0x1   :  { %v10_v0 = vld [vmem:[%s679_s0 + $0x10] sm:$0xff]  ;;  %v8_v1 = vld [vmem:[%s679_s0] sm:$0xff]  ;;  %v11_v2 = vld [vmem:[%s679_s0 + $0x18] sm:$0xff] }
   0x2   :  { %v31_v3 = vsel %vm24_vm0, %v10_v0, 0.0  ;;  %v25_v4 = vsel %vm24_vm0, %v8_v1, 0.0  ;;  %v9_v5 = vld [vmem:[%s679_s0 + $0x8] sm:$0xff]  ;;  %v34_v6 = vsel %vm24_vm0, %v11_v2, 0.0  ;;  %v12_v9 = vld [vmem:[%s679_s0 + $0x20] sm:$0xff]  ;;  %v15_v12 = vld [vmem:[%s679_s0 + $0x38] sm:$0xff]  ;;  %v73_v30 = vmul.f32 %v8_v1, %v8_v1 }
   0x3   :  { %32 = vadd.xlane.f32.xlu1 %v31_v3  ;;  %26 = vadd.xlane.f32.xlu0 %v25_v4  ;;  %v28_v7 = vsel %vm24_vm0, %v9_v5, 0.0  ;;  %v13_v8 = vld [vmem:[%s679_s0 + $0x28] sm:$0xff]  ;;  %v37_v11 = vsel %vm24_vm0, %v12_v9, 0.0  ;;  %v14_v13 = vld [vmem:[%s679_s0 + $0x30] sm:$0xff]  ;;  %v46_v14 = vsel %vm24_vm0, %v15_v12, 0.0  ;;  %v16_v17 = vld [vmem:[%s679_s0 + $0x40] sm:$0xff]  ;;  %v74_v33 = vmul.f32 %v9_v5, %v9_v5 }
   0x4   :  { %v40_v10 = vsel %vm24_vm0, %v13_v8, 0.0  ;;  %v43_v15 = vsel %vm24_vm0, %v14_v13, 0.0  ;;  %v17_v16 = vld [vmem:[%s679_s0 + $0x48] sm:$0xff]  ;;  %v49_v19 = vsel %vm24_vm0, %v16_v17, 0.0  ;;  %v19_v20 = vld [vmem:[%s679_s0 + $0x58] sm:$0xff]  ;;  %v18_v21 = vld [vmem:[%s679_s0 + $0x50] sm:$0xff]  ;;  %v75_v34 = vmul.f32 %v10_v0, %v10_v0 }
   0x5   :  { %v52_v18 = vsel %vm24_vm0, %v17_v16, 0.0  ;;  %v58_v22 = vsel %vm24_vm0, %v19_v20, 0.0  ;;  %v55_v23 = vsel %vm24_vm0, %v18_v21, 0.0  ;;  %v21_v24 = vld [vmem:[%s679_s0 + $0x68] sm:$0xff]  ;;  %v20_v25 = vld [vmem:[%s679_s0 + $0x60] sm:$0xff]  ;;  %v23_v28 = vld [vmem:[%s679_s0 + $0x78] sm:$0xff]  ;;  %v76_v37 = vmul.f32 %v11_v2, %v11_v2 }
   0x6   :  { %v64_v26 = vsel %vm24_vm0, %v21_v24, 0.0  ;;  %v61_v27 = vsel %vm24_vm0, %v20_v25, 0.0  ;;  %v22_v29 = vld [vmem:[%s679_s0 + $0x70] sm:$0xff]  ;;  %v70_v31 = vsel %vm24_vm0, %v23_v28, 0.0  ;;  %v92_v35 = vsel %vm24_vm0, %v74_v33, 0.0 }
   0x7   :  { %35 = vadd.xlane.f32.xlu1 %v34_v6  ;;  %29 = vadd.xlane.f32.xlu0 %v28_v7  ;;  %v67_v32 = vsel %vm24_vm0, %v22_v29, 0.0  ;;  %v89_v36 = vsel %vm24_vm0, %v73_v30, 0.0  ;;  %v98_v38 = vsel %vm24_vm0, %v76_v37, 0.0  ;;  %v95_v39 = vsel %vm24_vm0, %v75_v34, 0.0 }
   0x8   :  { %v78_v40 = vmul.f32 %v13_v8, %v13_v8  ;;  %v77_v41 = vmul.f32 %v12_v9, %v12_v9  ;;  %v80_v44 = vmul.f32 %v15_v12, %v15_v12  ;;  %v79_v45 = vmul.f32 %v14_v13, %v14_v13 }
   0x9   :  { %v82_v48 = vmul.f32 %v17_v16, %v17_v16  ;;  %v81_v49 = vmul.f32 %v16_v17, %v16_v17  ;;  %v84_v52 = vmul.f32 %v19_v20, %v19_v20  ;;  %v83_v53 = vmul.f32 %v18_v21, %v18_v21 }
   0xa   :  { %v104_v42 = vsel %vm24_vm0, %v78_v40, 0.0  ;;  %v101_v43 = vsel %vm24_vm0, %v77_v41, 0.0  ;;  %v110_v46 = vsel %vm24_vm0, %v80_v44, 0.0  ;;  %v107_v47 = vsel %vm24_vm0, %v79_v45, 0.0 }
   0xb   :  { %41 = vadd.xlane.f32.xlu1 %v40_v10  ;;  %38 = vadd.xlane.f32.xlu0 %v37_v11  ;;  %v116_v50 = vsel %vm24_vm0, %v82_v48, 0.0  ;;  %v113_v51 = vsel %vm24_vm0, %v81_v49, 0.0  ;;  %v122_v54 = vsel %vm24_vm0, %v84_v52, 0.0  ;;  %v119_v55 = vsel %vm24_vm0, %v83_v53, 0.0 }
   0xc   :  { %v86_v56 = vmul.f32 %v21_v24, %v21_v24  ;;  %v85_v57 = vmul.f32 %v20_v25, %v20_v25  ;;  %v88_v60 = vmul.f32 %v23_v28, %v23_v28  ;;  %v87_v61 = vmul.f32 %v22_v29, %v22_v29 }
   0xe   :  { %v128_v58 = vsel %vm24_vm0, %v86_v56, 0.0  ;;  %v125_v59 = vsel %vm24_vm0, %v85_v57, 0.0  ;;  %v134_v62 = vsel %vm24_vm0, %v88_v60, 0.0  ;;  %v131_v63 = vsel %vm24_vm0, %v87_v61, 0.0 }
   0xf   :  { %47 = vadd.xlane.f32.xlu1 %v46_v14  ;;  %44 = vadd.xlane.f32.xlu0 %v43_v15 }
  0x13   :  { %53 = vadd.xlane.f32.xlu1 %v52_v18  ;;  %50 = vadd.xlane.f32.xlu0 %v49_v19 }
  0x17   :  { %59 = vadd.xlane.f32.xlu1 %v58_v22  ;;  %56 = vadd.xlane.f32.xlu0 %v55_v23 }
  0x1b   :  { %65 = vadd.xlane.f32.xlu1 %v64_v26  ;;  %62 = vadd.xlane.f32.xlu0 %v61_v27 }
  0x1f   :  { %71 = vadd.xlane.f32.xlu1 %v70_v31  ;;  %68 = vadd.xlane.f32.xlu0 %v67_v32 }
  0x23   :  { %93 = vadd.xlane.f32.xlu1 %v92_v35  ;;  %90 = vadd.xlane.f32.xlu0 %v89_v36 }
  0x27   :  { %99 = vadd.xlane.f32.xlu1 %v98_v38  ;;  %96 = vadd.xlane.f32.xlu0 %v95_v39 }
  0x2b   :  { %105 = vadd.xlane.f32.xlu1 %v104_v42  ;;  %102 = vadd.xlane.f32.xlu0 %v101_v43 }
  0x2f   :  { %111 = vadd.xlane.f32.xlu1 %v110_v46  ;;  %108 = vadd.xlane.f32.xlu0 %v107_v47 }
  0x33   :  { %117 = vadd.xlane.f32.xlu1 %v116_v50  ;;  %114 = vadd.xlane.f32.xlu0 %v113_v51 }
  0x37   :  { %123 = vadd.xlane.f32.xlu1 %v122_v54  ;;  %120 = vadd.xlane.f32.xlu0 %v119_v55 }
  0x3b   :  { %129 = vadd.xlane.f32.xlu1 %v128_v58  ;;  %126 = vadd.xlane.f32.xlu0 %v125_v59 }
  0x3f   :  { %135 = vadd.xlane.f32.xlu1 %v134_v62  ;;  %132 = vadd.xlane.f32.xlu0 %v131_v63 }
  0x8c   :  { %v33_v0 = vpop.xlane.xlu1 %32  ;;  %v27_v1 = vpop.xlane.xlu0 %26 }
  0x8d   :  { %v137_v14 = vmul.f32 %v27_v1, %v27_v1  ;;  %v139_v18 = vmul.f32 %v33_v0, %v33_v0 }
  0x8f   :  { %v153_v20 = vmul.f32 0.0625, %v137_v14  ;;  %v155_v26 = vmul.f32 0.0625, %v139_v18 }
  0x90   :  { %v36_v2 = vpop.xlane.xlu1 %35  ;;  %v30_v3 = vpop.xlane.xlu0 %29 }
  0x91   :  { %v138_v15 = vmul.f32 %v30_v3, %v30_v3  ;;  %v140_v19 = vmul.f32 %v36_v2, %v36_v2 }
  0x93   :  { %v154_v21 = vmul.f32 0.0625, %v138_v15  ;;  %v156_v27 = vmul.f32 0.0625, %v140_v19 }
  0x94   :  { %v42_v4 = vpop.xlane.xlu1 %41  ;;  %v39_v5 = vpop.xlane.xlu0 %38 }
  0x95   :  { %v142_v28 = vmul.f32 %v42_v4, %v42_v4  ;;  %v141_v29 = vmul.f32 %v39_v5, %v39_v5 }
  0x97   :  { %v158_v38 = vmul.f32 0.0625, %v142_v28  ;;  %v157_v39 = vmul.f32 0.0625, %v141_v29 }
  0x98   :  { %v48_v6 = vpop.xlane.xlu1 %47  ;;  %v45_v7 = vpop.xlane.xlu0 %44 }
  0x99   :  { %v144_v40 = vmul.f32 %v48_v6, %v48_v6  ;;  %v143_v41 = vmul.f32 %v45_v7, %v45_v7 }
  0x9b   :  { %v160_v52 = vmul.f32 0.0625, %v144_v40  ;;  %v159_v53 = vmul.f32 0.0625, %v143_v41 }
  0x9c   :  { %v54_v8 = vpop.xlane.xlu1 %53  ;;  %v51_v9 = vpop.xlane.xlu0 %50 }
  0x9d   :  { %v146_v54 = vmul.f32 %v54_v8, %v54_v8  ;;  %v145_v57 = vmul.f32 %v51_v9, %v51_v9 }
  0x9f   :  { %v162_v2 = vmul.f32 0.0625, %v146_v54  ;;  %v161_v5 = vmul.f32 0.0625, %v145_v57 }
  0xa0   :  { %v60_v10 = vpop.xlane.xlu1 %59  ;;  %v57_v11 = vpop.xlane.xlu0 %56 }
  0xa1   :  { %v148_v58 = vmul.f32 %v60_v10, %v60_v10  ;;  %v147_v59 = vmul.f32 %v57_v11, %v57_v11 }
  0xa3   :  { %v164_v6 = vmul.f32 0.0625, %v148_v58  ;;  %v163_v7 = vmul.f32 0.0625, %v147_v59 }
  0xa4   :  { %v66_v12 = vpop.xlane.xlu1 %65  ;;  %v63_v13 = vpop.xlane.xlu0 %62 }
  0xa5   :  { %v150_v60 = vmul.f32 %v66_v12, %v66_v12  ;;  %v149_v61 = vmul.f32 %v63_v13, %v63_v13 }
  0xa7   :  { %v493_v8 = vmul.f32 0.0625, %v150_v60  ;;  %v495_v9 = vmul.f32 0.0625, %v149_v61 }
  0xa8   :  { %v472_v16 = vpop.xlane.xlu1 %71  ;;  %v474_v17 = vpop.xlane.xlu0 %68 }
  0xa9   :  { %v152_v10 = vmul.f32 %v472_v16, %v472_v16  ;;  %v502_v18 = vmul.f32 %v474_v17, %v474_v17 }
  0xac   :  { %v94_v22 = vpop.xlane.xlu1 %93  ;;  %v91_v23 = vpop.xlane.xlu0 %90 }
  0xad   :  { %v170_v24 = vsub.f32 %v94_v22, %v154_v21  ;;  %v169_v25 = vsub.f32 %v91_v23, %v153_v20 }
  0xaf   :  { %v186_v30 = vmul.f32 0.06666667, %v170_v24  ;;  %v185_v31 = vmul.f32 0.06666667, %v169_v25 }
  0xb0   :  { %v100_v32 = vpop.xlane.xlu1 %99  ;;  %v97_v33 = vpop.xlane.xlu0 %96 }
  0xb1   :  { %v476_v34 = vmax.f32 %v186_v30, 0.0  ;;  %v478_v35 = vmax.f32 %v185_v31, 0.0  ;;  %v172_v36 = vsub.f32 %v100_v32, %v156_v27  ;;  %v171_v37 = vsub.f32 %v97_v33, %v155_v26 }
  0xb3   :  { %350 = vrsqrt.f32 %v476_v34  ;;  %v188_v44 = vmul.f32 0.06666667, %v172_v36  ;;  %v187_v45 = vmul.f32 0.06666667, %v171_v37  ;;  %vm226_vm2 = vcmp.eq.f32.partialorder %v476_v34, inf }
  0xb4   :  { %352 = vrsqrt.f32 %v478_v35  ;;  %v106_v42 = vpop.xlane.xlu1 %105  ;;  %v103_v43 = vpop.xlane.xlu0 %102  ;;  %vm228_vm3 = vcmp.eq.f32.partialorder %v476_v34, 0.0  ;;  %v229_v19 = vand.u32 2147483648, %v476_v34  ;;  %vm219_vm4 = vcmp.eq.f32.partialorder %v478_v35, inf }
  0xb5   :  { %v174_v46 = vsub.f32 %v106_v42, %v158_v38  ;;  %v173_v47 = vsub.f32 %v103_v43, %v157_v39  ;;  %v482_v48 = vmax.f32 %v188_v44, 0.0  ;;  %v484_v49 = vmax.f32 %v187_v45, 0.0 }
  0xb6   :  { %v222_v25 = vand.u32 2147483648, %v478_v35  ;;  %vm221_vm5 = vcmp.eq.f32.partialorder %v478_v35, 0.0  ;;  %v168_v36 = vmul.f32 0.0625, %v152_v10 }
  0xb7   :  { %v190_v50 = vmul.f32 0.06666667, %v174_v46  ;;  %v189_v51 = vmul.f32 0.06666667, %v173_v47  ;;  %354 = vrsqrt.f32 %v482_v48  ;;  %vm240_vm6 = vcmp.eq.f32.partialorder %v482_v48, inf }
  0xb8   :  { %v112_v55 = vpop.xlane.xlu1 %111  ;;  %v109_v56 = vpop.xlane.xlu0 %108  ;;  %356 = vrsqrt.f32 %v484_v49  ;;  %vm242_vm7 = vcmp.eq.f32.partialorder %v482_v48, 0.0  ;;  %vm233_vm8 = vcmp.eq.f32.partialorder %v484_v49, inf  ;;  %vm235_vm9 = vcmp.eq.f32.partialorder %v484_v49, 0.0 }
  0xb9   :  { %v488_v62 = vmax.f32 %v190_v50, 0.0  ;;  %v490_v63 = vmax.f32 %v189_v51, 0.0  ;;  %v176_v0 = vsub.f32 %v112_v55, %v160_v52  ;;  %v175_v1 = vsub.f32 %v109_v56, %v159_v53 }
  0xba   :  { %v236_v51 = vand.u32 2147483648, %v484_v49 }
  0xbb   :  { %358 = vrsqrt.f32 %v488_v62  ;;  %v192_v11 = vmul.f32 0.06666667, %v176_v0  ;;  %v191_v12 = vmul.f32 0.06666667, %v175_v1  ;;  %vm254_vm10 = vcmp.eq.f32.partialorder %v488_v62, inf }
  0xbc   :  { %v118_v3 = vpop.xlane.xlu1 %117  ;;  %v115_v4 = vpop.xlane.xlu0 %114  ;;  %360 = vrsqrt.f32 %v490_v63  ;;  %vm256_vm11 = vcmp.eq.f32.partialorder %v488_v62, 0.0  ;;  %v257_v55 = vand.u32 2147483648, %v488_v62  ;;  %vm247_vm12 = vcmp.eq.f32.partialorder %v490_v63, inf }
  0xbd   :  { %v178_v13 = vsub.f32 %v118_v3, %v162_v2  ;;  %v177_v14 = vsub.f32 %v115_v4, %v161_v5  ;;  %v509_v23 = vmax.f32 %v192_v11, 0.0  ;;  %v511_v24 = vmax.f32 %v191_v12, 0.0 }
  0xbe   :  { %v250_v2 = vand.u32 2147483648, %v490_v63  ;;  %vm249_vm13 = vcmp.eq.f32.partialorder %v490_v63, 0.0 }
  0xbf   :  { %v194_v26 = vmul.f32 0.06666667, %v178_v13  ;;  %v193_v27 = vmul.f32 0.06666667, %v177_v14  ;;  %362 = vrsqrt.f32 %v509_v23  ;;  %vm268_vm14 = vcmp.eq.f32.partialorder %v509_v23, inf }
  0xc0   :  { %v351_v15 = vpop.eup %350  ;;  %v124_v20 = vpop.xlane.xlu1 %123  ;;  %364 = vrsqrt.f32 %v511_v24  ;;  %vm270_vm15 = vcmp.eq.f32.partialorder %v509_v23, 0.0  ;;  %v271_v14 = vand.u32 2147483648, %v509_v23  ;;  %vm261_vm0 = vcmp.eq.f32.partialorder %v511_v24, inf }
  0xc1   :  { %v121_v21 = vpop.xlane.xlu0 %120  ;;  %v353_v16 = vpop.eup %352  ;;  %v225_v22 = vmul.f32 %v351_v15, %v476_v34  ;;  %v180_v29 = vsub.f32 %v124_v20, %v164_v6  ;;  %v534_v39 = vmax.f32 %v194_v26, 0.0  ;;  %v536_v40 = vmax.f32 %v193_v27, 0.0 }
  0xc2   :  { %v218_v17 = vmul.f32 %v353_v16, %v478_v35  ;;  %v179_v30 = vsub.f32 %v121_v21, %v163_v7  ;;  %v167_v7 = vmul.f32 0.0625, %v502_v18 }
  0xc3   :  { %v227_v28 = vsel %vm226_vm2, %v476_v34, %v225_v22  ;;  %v196_v43 = vmul.f32 0.06666667, %v180_v29  ;;  %366 = vrsqrt.f32 %v534_v39  ;;  %vm263_vm2 = vcmp.eq.f32.partialorder %v511_v24, 0.0 }
  0xc4   :  { %v230_v31 = vsel %vm228_vm3, %v229_v19, %v227_v28  ;;  %v220_v32 = vsel %vm219_vm4, %v478_v35, %v218_v17  ;;  %v130_v33 = vpop.xlane.xlu1 %129  ;;  %v355_v38 = vpop.eup %354  ;;  %v243_v35 = vand.u32 2147483648, %v482_v48  ;;  %v195_v44 = vmul.f32 0.06666667, %v179_v30 }
  0xc5   :  { %331 = vst.msk [vmem:[%s680_s1 + $0x8] sm:$0xff] %vm329_vm1, %v230_v31  ;;  %v223_v37 = vsel %vm221_vm5, %v222_v25, %v220_v32  ;;  %v127_v34 = vpop.xlane.xlu0 %126  ;;  %v357_v41 = vpop.eup %356  ;;  %v239_v42 = vmul.f32 %v355_v38, %v482_v48  ;;  %v182_v46 = vsub.f32 %v130_v33, %v493_v8  ;;  %368 = vrsqrt.f32 %v536_v40 }
  0xc6   :  { %330 = vst.msk [vmem:[%s680_s1] sm:$0xff] %vm329_vm1, %v223_v37  ;;  %v232_v45 = vmul.f32 %v357_v41, %v484_v49  ;;  %v181_v47 = vsub.f32 %v127_v34, %v495_v9  ;;  %v564_v59 = vmax.f32 %v196_v43, 0.0  ;;  %v566_v60 = vmax.f32 %v195_v44, 0.0 }
  0xc7   :  { %v241_v50 = vsel %vm240_vm6, %v482_v48, %v239_v42  ;;  %v198_v0 = vmul.f32 0.06666667, %v182_v46  ;;  %v264_v19 = vand.u32 2147483648, %v511_v24  ;;  %vm282_vm3 = vcmp.eq.f32.partialorder %v534_v39, inf }
  0xc8   :  { %v359_v52 = vpop.eup %358  ;;  %v244_v53 = vsel %vm242_vm7, %v243_v35, %v241_v50  ;;  %v234_v54 = vsel %vm233_vm8, %v484_v49, %v232_v45  ;;  %v136_v56 = vpop.xlane.xlu1 %135  ;;  %v197_v1 = vmul.f32 0.06666667, %v181_v47  ;;  %370 = vrsqrt.f32 %v564_v59 }
  0xc9   :  { %v361_v57 = vpop.eup %360  ;;  %333 = vst.msk [vmem:[%s680_s1 + $0x18] sm:$0xff] %vm329_vm1, %v244_v53  ;;  %v237_v58 = vsel %vm235_vm9, %v236_v51, %v234_v54  ;;  %v253_v48 = vmul.f32 %v359_v52, %v488_v62  ;;  %v184_v3 = vsub.f32 %v136_v56, %v168_v36  ;;  %372 = vrsqrt.f32 %v566_v60  ;;  %v133_v6 = vpop.xlane.xlu0 %132 }
  0xca   :  { %332 = vst.msk [vmem:[%s680_s1 + $0x10] sm:$0xff] %vm329_vm1, %v237_v58  ;;  %v246_v61 = vmul.f32 %v361_v57, %v490_v63  ;;  %v183_v13 = vsub.f32 %v133_v6, %v167_v7  ;;  %vm284_vm4 = vcmp.eq.f32.partialorder %v534_v39, 0.0  ;;  %vm275_vm5 = vcmp.eq.f32.partialorder %v536_v40, inf }
  0xcb   :  { %v255_v49 = vsel %vm254_vm10, %v488_v62, %v253_v48  ;;  %v593_v62 = vmax.f32 %v198_v0, 0.0  ;;  %v200_v12 = vmul.f32 0.06666667, %v184_v3  ;;  %v278_v29 = vand.u32 2147483648, %v536_v40 }
  0xcc   :  { %v258_v4 = vsel %vm256_vm11, %v257_v55, %v255_v49  ;;  %v248_v5 = vsel %vm247_vm12, %v490_v63, %v246_v61  ;;  %v363_v9 = vpop.eup %362  ;;  %v595_v63 = vmax.f32 %v197_v1, 0.0  ;;  %vm277_vm6 = vcmp.eq.f32.partialorder %v536_v40, 0.0 }
  0xcd   :  { %335 = vst.msk [vmem:[%s680_s1 + $0x28] sm:$0xff] %vm329_vm1, %v258_v4  ;;  %v251_v8 = vsel %vm249_vm13, %v250_v2, %v248_v5  ;;  %v365_v10 = vpop.eup %364  ;;  %v267_v11 = vmul.f32 %v363_v9, %v509_v23  ;;  %374 = vrsqrt.f32 %v593_v62  ;;  %v216_v17 = vmax.f32 %v200_v12, 0.0 }
  0xce   :  { %334 = vst.msk [vmem:[%s680_s1 + $0x20] sm:$0xff] %vm329_vm1, %v251_v8  ;;  %v260_v15 = vmul.f32 %v365_v10, %v511_v24  ;;  %376 = vrsqrt.f32 %v595_v63  ;;  %vm296_vm7 = vcmp.eq.f32.partialorder %v564_v59, inf  ;;  %v299_v38 = vand.u32 2147483648, %v564_v59 }
  0xcf   :  { %v269_v18 = vsel %vm268_vm14, %v509_v23, %v267_v11  ;;  %v199_v23 = vmul.f32 0.06666667, %v183_v13  ;;  %378 = vrsqrt.f32 %v216_v17  ;;  %vm298_vm8 = vcmp.eq.f32.partialorder %v564_v59, 0.0 }
  0xd0   :  { %v272_v20 = vsel %vm270_vm15, %v271_v14, %v269_v18  ;;  %v262_v21 = vsel %vm261_vm0, %v511_v24, %v260_v15  ;;  %v367_v16 = vpop.eup %366  ;;  %v285_v24 = vand.u32 2147483648, %v534_v39  ;;  %vm289_vm9 = vcmp.eq.f32.partialorder %v566_v60, inf }
  0xd1   :  { %337 = vst.msk [vmem:[%s680_s1 + $0x38] sm:$0xff] %vm329_vm1, %v272_v20  ;;  %v265_v22 = vsel %vm263_vm2, %v264_v19, %v262_v21  ;;  %v281_v26 = vmul.f32 %v367_v16, %v534_v39  ;;  %v215_v30 = vmax.f32 %v199_v23, 0.0  ;;  %vm291_vm10 = vcmp.eq.f32.partialorder %v566_v60, 0.0 }
  0xd2   :  { %v369_v25 = vpop.eup %368  ;;  %336 = vst.msk [vmem:[%s680_s1 + $0x30] sm:$0xff] %vm329_vm1, %v265_v22  ;;  %vm310_vm11 = vcmp.eq.f32.partialorder %v593_v62, inf  ;;  %v313_v47 = vand.u32 2147483648, %v593_v62  ;;  %vm312_vm12 = vcmp.eq.f32.partialorder %v593_v62, 0.0  ;;  %vm303_vm13 = vcmp.eq.f32.partialorder %v595_v63, inf }
  0xd3   :  { %v274_v27 = vmul.f32 %v369_v25, %v536_v40  ;;  %v283_v28 = vsel %vm282_vm3, %v534_v39, %v281_v26  ;;  %380 = vrsqrt.f32 %v215_v30  ;;  %v306_v52 = vand.u32 2147483648, %v595_v63 }
  0xd4   :  { %v286_v31 = vsel %vm284_vm4, %v285_v24, %v283_v28  ;;  %vm305_vm14 = vcmp.eq.f32.partialorder %v595_v63, 0.0  ;;  %vm324_vm15 = vcmp.eq.f32.partialorder %v216_v17, inf  ;;  %v327_v58 = vand.u32 2147483648, %v216_v17 }
  0xd5   :  { %v276_v32 = vsel %vm275_vm5, %v536_v40, %v274_v27  ;;  %v371_v33 = vpop.eup %370  ;;  %339 = vst.msk [vmem:[%s680_s1 + $0x48] sm:$0xff] %vm329_vm1, %v286_v31  ;;  %v292_v40 = vand.u32 2147483648, %v566_v60  ;;  %vm326_vm0 = vcmp.eq.f32.partialorder %v216_v17, 0.0  ;;  %vm317_vm2 = vcmp.eq.f32.partialorder %v215_v30, inf }
  0xd6   :  { %v279_v36 = vsel %vm277_vm6, %v278_v29, %v276_v32  ;;  %v373_v37 = vpop.eup %372  ;;  %v295_v34 = vmul.f32 %v371_v33, %v564_v59  ;;  %v320_v0 = vand.u32 2147483648, %v215_v30  ;;  %vm319_vm3 = vcmp.eq.f32.partialorder %v215_v30, 0.0 }
  0xd7   :  { %338 = vst.msk [vmem:[%s680_s1 + $0x40] sm:$0xff] %vm329_vm1, %v279_v36  ;;  %v288_v35 = vmul.f32 %v373_v37, %v566_v60 }
  0xd8   :  { %v297_v39 = vsel %vm296_vm7, %v564_v59, %v295_v34 }
  0xd9   :  { %v300_v41 = vsel %vm298_vm8, %v299_v38, %v297_v39  ;;  %v290_v42 = vsel %vm289_vm9, %v566_v60, %v288_v35 }
  0xda   :  { %v375_v43 = vpop.eup %374  ;;  %341 = vst.msk [vmem:[%s680_s1 + $0x58] sm:$0xff] %vm329_vm1, %v300_v41  ;;  %v293_v44 = vsel %vm291_vm10, %v292_v40, %v290_v42 }
  0xdb   :  { %v377_v45 = vpop.eup %376  ;;  %340 = vst.msk [vmem:[%s680_s1 + $0x50] sm:$0xff] %vm329_vm1, %v293_v44  ;;  %v309_v46 = vmul.f32 %v375_v43, %v593_v62 }
  0xdc   :  { %v302_v50 = vmul.f32 %v377_v45, %v595_v63  ;;  %v379_v55 = vpop.eup %378 }
  0xdd   :  { %v311_v51 = vsel %vm310_vm11, %v593_v62, %v309_v46  ;;  %v323_v57 = vmul.f32 %v379_v55, %v216_v17 }
  0xde   :  { %v314_v53 = vsel %vm312_vm12, %v313_v47, %v311_v51  ;;  %v304_v54 = vsel %vm303_vm13, %v595_v63, %v302_v50 }
  0xdf   :  { %343 = vst.msk [vmem:[%s680_s1 + $0x68] sm:$0xff] %vm329_vm1, %v314_v53  ;;  %v307_v56 = vsel %vm305_vm14, %v306_v52, %v304_v54  ;;  %v325_v59 = vsel %vm324_vm15, %v216_v17, %v323_v57 }
  0xe0   :  { %342 = vst.msk [vmem:[%s680_s1 + $0x60] sm:$0xff] %vm329_vm1, %v307_v56  ;;  %v381_v48 = vpop.eup %380  ;;  %v328_v60 = vsel %vm326_vm0, %v327_v58, %v325_v59 }
  0xe1   :  { %v316_v61 = vmul.f32 %v381_v48, %v215_v30  ;;  %345 = vst.msk [vmem:[%s680_s1 + $0x78] sm:$0xff] %vm329_vm1, %v328_v60 }
  0xe3   :  { %v318_v1 = vsel %vm317_vm2, %v215_v30, %v316_v61 }
  0xe4   :  { %v321_v49 = vsel %vm319_vm3, %v320_v0, %v318_v1 }
  0xe5   :  { %344 = vst.msk [vmem:[%s680_s1 + $0x70] sm:$0xff] %vm329_vm1, %v321_v49 }

</bundles_post_ra>
